<compile_context>
chip_gen: v7x
topology: tpu7x:2x2x1
jax: 0.10.0
libtpu: 0.0.40
codegen_flags: <defaults>
</compile_context>

<pallas_src>
import functools

import jax
import jax.numpy as jnp
from jax.experimental import pallas as pl
from jax.experimental.pallas import tpu as pltpu


_NEG_BIG = -1e30  # plain Python float: lowers as a literal, not a captured const


def _ls_ce_kernel(yhat_ref, labels_ref, smooth_ref, out_ref,
                  m_ref, l_ref, xsum_ref, gath_ref, *, n_total, c_total):
    i = pl.program_id(0)              # row-tile index   (parallel)
    j = pl.program_id(1)              # class-chunk index (arbitrary / reduction)
    nj = pl.num_programs(1)

    x = yhat_ref[...].astype(jnp.float32)            # (TILE_N, TILE_C)
    tn, tc = x.shape

    # Global column ids for this chunk + validity mask (C may not divide TILE_C).
    col = j * tc + jax.lax.broadcasted_iota(jnp.int32, (tn, tc), 1)
    col_valid = col < c_total
    x_m = jnp.where(col_valid, x, _NEG_BIG)          # for max / exp
    x_z = jnp.where(col_valid, x, 0.0)               # for plain sums / gather

    @pl.when(j == 0)
    def _init():
        m_ref[...] = jnp.full_like(m_ref, _NEG_BIG)
        l_ref[...] = jnp.zeros_like(l_ref)
        xsum_ref[...] = jnp.zeros_like(xsum_ref)
        gath_ref[...] = jnp.zeros_like(gath_ref)

    # Online logsumexp update over the class axis.
    m_old = m_ref[...]                                            # (TILE_N, 1)
    m_loc = jnp.max(x_m, axis=-1, keepdims=True)
    m_new = jnp.maximum(m_old, m_loc)
    l_ref[...] = (l_ref[...] * jnp.exp(m_old - m_new)
                  + jnp.sum(jnp.exp(x_m - m_new), axis=-1, keepdims=True))
    m_ref[...] = m_new

    # Raw sum of logits (for mean(logp) = sum(x)/C - lse).
    xsum_ref[...] = xsum_ref[...] + jnp.sum(x_z, axis=-1, keepdims=True)

    # Gather x[row, label] via one-hot compare against global column ids.
    labels = labels_ref[...]                                      # (TILE_N, 1) i32
    onehot = col == labels
    gath_ref[...] = gath_ref[...] + jnp.sum(
        jnp.where(onehot, x_z, 0.0), axis=-1, keepdims=True)

    @pl.when(j == nj - 1)
    def _finalize():
        s = smooth_ref[0]                                         # f32 scalar
        lse = m_ref[...] + jnp.log(l_ref[...])                    # (TILE_N, 1)
        nll = gath_ref[...] - lse                                 # logp[row, label]
        mean_logp = xsum_ref[...] * (1.0 / c_total) - lse         # mean(logp, -1)
        per_row = (1.0 - s) * nll + s * mean_logp                 # (TILE_N, 1)

        # Mask rows past the true batch size (last partial row tile).
        row = i * tn + jax.lax.broadcasted_iota(jnp.int32, (tn, 1), 0)
        per_row = jnp.where(row < n_total, per_row, 0.0)

        partial = jnp.sum(per_row)                                # scalar
        # Lane-dense (1, 8, 128) write; wrapper reads [:, 0, 0].
        out_ref[...] = jnp.full((1, 8, 128), partial, dtype=out_ref.dtype)


def label_smoothing_cross_entropy(y_hat, labels, smoothing, *,
                                  tile_n=128, tile_c=2048):
    """y_hat: (N, C) float (f32/bf16), labels: (N,) int, smoothing: scalar."""
    n, c = y_hat.shape
    # Block dims: either the full dim, or a (8, 128)-aligned tile of it.
    tn = n if n <= tile_n else ((tile_n + 7) // 8) * 8
    tc = c if c <= tile_c else ((tile_c + 127) // 128) * 128
    grid = (pl.cdiv(n, tn), pl.cdiv(c, tc))
    num_row_tiles = grid[0]

    labels2d = labels.reshape(n, 1).astype(jnp.int32)
    smooth_arr = jnp.asarray(smoothing, dtype=jnp.float32).reshape(1)

    kernel = functools.partial(_ls_ce_kernel, n_total=n, c_total=c)

    partials = pl.pallas_call(
        kernel,
        grid=grid,
        out_shape=jax.ShapeDtypeStruct((num_row_tiles, 8, 128), jnp.float32),
        in_specs=[
            pl.BlockSpec((tn, tc), lambda i, j: (i, j)),          # y_hat tile
            pl.BlockSpec((tn, 1), lambda i, j: (i, 0)),           # labels tile
            pl.BlockSpec(memory_space=pltpu.MemorySpace.SMEM),    # smoothing
        ],
        out_specs=pl.BlockSpec((1, 8, 128), lambda i, j: (i, 0, 0)),
        scratch_shapes=[pltpu.VMEM((tn, 1), jnp.float32)] * 4,    # m, l, xsum, gath
        compiler_params=pltpu.CompilerParams(
            dimension_semantics=("parallel", "arbitrary")),
    )(y_hat, labels2d, smooth_arr)

    # Tiny final reduction in JAX; divide by the GLOBAL batch size.
    return -(jnp.sum(partials[:, 0, 0]) / n)


def _reference(y_hat, labels, smoothing):
    logp = jax.nn.log_softmax(y_hat.astype(jnp.float32), axis=-1)
    sl = jnp.mean(logp, axis=-1) * smoothing
    nll = jnp.take_along_axis(logp, labels.reshape(-1, 1), axis=-1)[:, 0]
    return -jnp.mean((1.0 - smoothing) * nll + sl)


if __name__ == "__main__":
    key = jax.random.PRNGKey(0)
    k1, k2, k3, k4 = jax.random.split(key, 4)

    # Small classification-head shapes: batch=16, classes=128, f32 logits.
    N, C = 16, 128
    y_hat = jax.random.normal(k1, (N, C), dtype=jnp.float32)
    labels = jax.random.randint(k2, (N,), 0, C, dtype=jnp.int32)
    smoothing = 0.1

    loss = jax.block_until_ready(
        label_smoothing_cross_entropy(y_hat, labels, smoothing))
    ref = _reference(y_hat, labels, smoothing)
    assert jnp.allclose(loss, ref, atol=1e-5, rtol=1e-5), (loss, ref)

    # Second check: bf16 on the wire, multi-tile grid with partial tiles in
    # both axes (exercises row/col masking and the online logsumexp carry).
    N2, C2 = 200, 1500
    y2 = (jax.random.normal(k3, (N2, C2), dtype=jnp.float32) * 3.0
          ).astype(jnp.bfloat16)
    l2 = jax.random.randint(k4, (N2,), 0, C2, dtype=jnp.int32)
    loss2 = jax.block_until_ready(
        label_smoothing_cross_entropy(y2, l2, 0.2, tile_n=64, tile_c=512))
    ref2 = _reference(y2, l2, 0.2)
    assert jnp.allclose(loss2, ref2, atol=1e-4, rtol=1e-4), (loss2, ref2)

    print("KERNEL_OK")
</pallas_src>

<mosaic_0001>
module attributes {stable_mosaic.version = 11 : i64} {
  func.func @_ls_ce_kernel(%arg0: i32, %arg1: i32, %arg2: memref<16x128xf32, #tpu.memory_space<vmem>>, %arg3: memref<16x1xi32, #tpu.memory_space<vmem>>, %arg4: memref<1xf32, #tpu.memory_space<smem>>, %arg5: memref<1x8x128xf32, #tpu.memory_space<vmem>>, %arg6: memref<16x1xf32, #tpu.memory_space<vmem>>, %arg7: memref<16x1xf32, #tpu.memory_space<vmem>>, %arg8: memref<16x1xf32, #tpu.memory_space<vmem>>, %arg9: memref<16x1xf32, #tpu.memory_space<vmem>>) attributes {dimension_semantics = [#tpu.dimension_semantics<parallel>, #tpu.dimension_semantics<arbitrary>], iteration_bounds = array<i64: 1, 1>, scalar_prefetch = 0 : i64, scratch_operands = 4 : i64, tpu.core_type = #tpu.core_type<tc>, window_params = [{transform_indices = @transform_0, window_bounds = array<i64: 16, 128>}, {transform_indices = @transform_1, window_bounds = array<i64: 16, 1>}, {transform_indices = @transform_2, window_bounds = array<i64: 1>}, {transform_indices = @transform_3, window_bounds = array<i64: 1, 8, 128>}]} {
    %c0 = arith.constant 0 : index
    %c0_0 = arith.constant 0 : index
    %0 = vector.load %arg2[%c0, %c0_0] : memref<16x128xf32, #tpu.memory_space<vmem>>, vector<16x128xf32>
    %c128_i32 = arith.constant 128 : i32
    %1 = arith.muli %arg1, %c128_i32 : i32
    %2 = tpu.iota {dimensions = array<i32: 1>} : vector<16x128xi32>
    %3 = vector.broadcast %1 : i32 to vector<16x128xi32>
    %4 = arith.addi %3, %2 : vector<16x128xi32>
    %c128_i32_1 = arith.constant 128 : i32
    %5 = vector.broadcast %c128_i32_1 : i32 to vector<16x128xi32>
    %6 = arith.cmpi slt, %4, %5 : vector<16x128xi32>
    %cst = arith.constant -1.000000e+30 : f32
    %7 = vector.broadcast %cst : f32 to vector<16x128xf32>
    %8 = arith.select %6, %0, %7 : vector<16x128xi1>, vector<16x128xf32>
    %cst_2 = arith.constant 0.000000e+00 : f32
    %9 = vector.broadcast %cst_2 : f32 to vector<16x128xf32>
    %10 = arith.select %6, %0, %9 : vector<16x128xi1>, vector<16x128xf32>
    %c0_i32 = arith.constant 0 : i32
    %11 = arith.cmpi eq, %arg1, %c0_i32 : i32
    %12 = arith.extui %11 : i1 to i32
    %c0_i32_3 = arith.constant 0 : i32
    %13 = arith.cmpi ne, %12, %c0_i32_3 : i32
    scf.if %13 {
      %cst_29 = arith.constant -1.000000e+30 : f32
      %48 = vector.broadcast %cst_29 : f32 to vector<16x1xf32>
      %c0_30 = arith.constant 0 : index
      %c0_31 = arith.constant 0 : index
      %49 = vector.load %arg6[%c0_30, %c0_31] : memref<16x1xf32, #tpu.memory_space<vmem>>, vector<16x1xf32>
      tpu.vector_store %arg6[%c0_30, %c0_31], %48 {strides = array<i32>} : memref<16x1xf32, #tpu.memory_space<vmem>>, vector<16x1xf32>,
      %cst_32 = arith.constant 0.000000e+00 : f32
      %50 = vector.broadcast %cst_32 : f32 to vector<16x1xf32>
      %c0_33 = arith.constant 0 : index
      %c0_34 = arith.constant 0 : index
      %51 = vector.load %arg7[%c0_33, %c0_34] : memref<16x1xf32, #tpu.memory_space<vmem>>, vector<16x1xf32>
      tpu.vector_store %arg7[%c0_33, %c0_34], %50 {strides = array<i32>} : memref<16x1xf32, #tpu.memory_space<vmem>>, vector<16x1xf32>,
      %cst_35 = arith.constant 0.000000e+00 : f32
      %52 = vector.broadcast %cst_35 : f32 to vector<16x1xf32>
      %c0_36 = arith.constant 0 : index
      %c0_37 = arith.constant 0 : index
      %53 = vector.load %arg8[%c0_36, %c0_37] : memref<16x1xf32, #tpu.memory_space<vmem>>, vector<16x1xf32>
      tpu.vector_store %arg8[%c0_36, %c0_37], %52 {strides = array<i32>} : memref<16x1xf32, #tpu.memory_space<vmem>>, vector<16x1xf32>,
      %cst_38 = arith.constant 0.000000e+00 : f32
      %54 = vector.broadcast %cst_38 : f32 to vector<16x1xf32>
      %c0_39 = arith.constant 0 : index
      %c0_40 = arith.constant 0 : index
      %55 = vector.load %arg9[%c0_39, %c0_40] : memref<16x1xf32, #tpu.memory_space<vmem>>, vector<16x1xf32>
      tpu.vector_store %arg9[%c0_39, %c0_40], %54 {strides = array<i32>} : memref<16x1xf32, #tpu.memory_space<vmem>>, vector<16x1xf32>,
    } else {
    }
    %c0_4 = arith.constant 0 : index
    %c0_5 = arith.constant 0 : index
    %14 = vector.load %arg6[%c0_4, %c0_5] : memref<16x1xf32, #tpu.memory_space<vmem>>, vector<16x1xf32>
    %cst_6 = arith.constant dense<0xFF800000> : vector<16xf32>
    %15 = vector.multi_reduction <maximumf>, %8, %cst_6 [1] : vector<16x128xf32> to vector<16xf32>
    %16 = vector.shape_cast %15 : vector<16xf32> to vector<16x1xf32>
    %17 = arith.maximumf %14, %16 : vector<16x1xf32>
    %c0_7 = arith.constant 0 : index
    %c0_8 = arith.constant 0 : index
    %18 = vector.load %arg7[%c0_7, %c0_8] : memref<16x1xf32, #tpu.memory_space<vmem>>, vector<16x1xf32>
    %19 = arith.subf %14, %17 : vector<16x1xf32>
    %20 = math.exp %19 : vector<16x1xf32>
    %21 = arith.mulf %18, %20 : vector<16x1xf32>
    %22 = vector.broadcast %17 : vector<16x1xf32> to vector<16x128xf32>
    %23 = arith.subf %8, %22 : vector<16x128xf32>
    %24 = math.exp %23 : vector<16x128xf32>
    %cst_9 = arith.constant dense<0.000000e+00> : vector<16xf32>
    %25 = vector.multi_reduction <add>, %24, %cst_9 [1] : vector<16x128xf32> to vector<16xf32>
    %26 = vector.shape_cast %25 : vector<16xf32> to vector<16x1xf32>
    %27 = arith.addf %21, %26 : vector<16x1xf32>
    %c0_10 = arith.constant 0 : index
    %c0_11 = arith.constant 0 : index
    %28 = vector.load %arg7[%c0_10, %c0_11] : memref<16x1xf32, #tpu.memory_space<vmem>>, vector<16x1xf32>
    tpu.vector_store %arg7[%c0_10, %c0_11], %27 {strides = array<i32>} : memref<16x1xf32, #tpu.memory_space<vmem>>, vector<16x1xf32>,
    %c0_12 = arith.constant 0 : index
    %c0_13 = arith.constant 0 : index
    %29 = vector.load %arg6[%c0_12, %c0_13] : memref<16x1xf32, #tpu.memory_space<vmem>>, vector<16x1xf32>
    tpu.vector_store %arg6[%c0_12, %c0_13], %17 {strides = array<i32>} : memref<16x1xf32, #tpu.memory_space<vmem>>, vector<16x1xf32>,
    %c0_14 = arith.constant 0 : index
    %c0_15 = arith.constant 0 : index
    %30 = vector.load %arg8[%c0_14, %c0_15] : memref<16x1xf32, #tpu.memory_space<vmem>>, vector<16x1xf32>
    %cst_16 = arith.constant dense<0.000000e+00> : vector<16xf32>
    %31 = vector.multi_reduction <add>, %10, %cst_16 [1] : vector<16x128xf32> to vector<16xf32>
    %32 = vector.shape_cast %31 : vector<16xf32> to vector<16x1xf32>
    %33 = arith.addf %30, %32 : vector<16x1xf32>
    %c0_17 = arith.constant 0 : index
    %c0_18 = arith.constant 0 : index
    %34 = vector.load %arg8[%c0_17, %c0_18] : memref<16x1xf32, #tpu.memory_space<vmem>>, vector<16x1xf32>
    tpu.vector_store %arg8[%c0_17, %c0_18], %33 {strides = array<i32>} : memref<16x1xf32, #tpu.memory_space<vmem>>, vector<16x1xf32>,
    %c0_19 = arith.constant 0 : index
    %c0_20 = arith.constant 0 : index
    %35 = vector.load %arg3[%c0_19, %c0_20] : memref<16x1xi32, #tpu.memory_space<vmem>>, vector<16x1xi32>
    %36 = vector.broadcast %35 : vector<16x1xi32> to vector<16x128xi32>
    %37 = arith.cmpi eq, %4, %36 : vector<16x128xi32>
    %c0_21 = arith.constant 0 : index
    %c0_22 = arith.constant 0 : index
    %38 = vector.load %arg9[%c0_21, %c0_22] : memref<16x1xf32, #tpu.memory_space<vmem>>, vector<16x1xf32>
    %cst_23 = arith.constant 0.000000e+00 : f32
    %39 = vector.broadcast %cst_23 : f32 to vector<16x128xf32>
    %40 = arith.select %37, %10, %39 : vector<16x128xi1>, vector<16x128xf32>
    %cst_24 = arith.constant dense<0.000000e+00> : vector<16xf32>
    %41 = vector.multi_reduction <add>, %40, %cst_24 [1] : vector<16x128xf32> to vector<16xf32>
    %42 = vector.shape_cast %41 : vector<16xf32> to vector<16x1xf32>
    %43 = arith.addf %38, %42 : vector<16x1xf32>
    %c0_25 = arith.constant 0 : index
    %c0_26 = arith.constant 0 : index
    %44 = vector.load %arg9[%c0_25, %c0_26] : memref<16x1xf32, #tpu.memory_space<vmem>>, vector<16x1xf32>
    tpu.vector_store %arg9[%c0_25, %c0_26], %43 {strides = array<i32>} : memref<16x1xf32, #tpu.memory_space<vmem>>, vector<16x1xf32>,
    %c0_i32_27 = arith.constant 0 : i32
    %45 = arith.cmpi eq, %arg1, %c0_i32_27 : i32
    %46 = arith.extui %45 : i1 to i32
    %c0_i32_28 = arith.constant 0 : i32
    %47 = arith.cmpi ne, %46, %c0_i32_28 : i32
    scf.if %47 {
      %c0_29 = arith.constant 0 : index
      %48 = memref.load %arg4[%c0_29] : memref<1xf32, #tpu.memory_space<smem>>
      %c0_30 = arith.constant 0 : index
      %c0_31 = arith.constant 0 : index
      %49 = vector.load %arg6[%c0_30, %c0_31] : memref<16x1xf32, #tpu.memory_space<vmem>>, vector<16x1xf32>
      %c0_32 = arith.constant 0 : index
      %c0_33 = arith.constant 0 : index
      %50 = vector.load %arg7[%c0_32, %c0_33] : memref<16x1xf32, #tpu.memory_space<vmem>>, vector<16x1xf32>
      %51 = math.log %50 : vector<16x1xf32>
      %52 = arith.addf %49, %51 : vector<16x1xf32>
      %c0_34 = arith.constant 0 : index
      %c0_35 = arith.constant 0 : index
      %53 = vector.load %arg9[%c0_34, %c0_35] : memref<16x1xf32, #tpu.memory_space<vmem>>, vector<16x1xf32>
      %54 = arith.subf %53, %52 : vector<16x1xf32>
      %c0_36 = arith.constant 0 : index
      %c0_37 = arith.constant 0 : index
      %55 = vector.load %arg8[%c0_36, %c0_37] : memref<16x1xf32, #tpu.memory_space<vmem>>, vector<16x1xf32>
      %cst_38 = arith.constant 7.812500e-03 : f32
      %56 = vector.broadcast %cst_38 : f32 to vector<16x1xf32>
      %57 = arith.mulf %55, %56 : vector<16x1xf32>
      %58 = arith.subf %57, %52 : vector<16x1xf32>
      %cst_39 = arith.constant 1.000000e+00 : f32
      %59 = arith.subf %cst_39, %48 : f32
      %60 = vector.broadcast %59 : f32 to vector<16x1xf32>
      %61 = arith.mulf %60, %54 : vector<16x1xf32>
      %62 = vector.broadcast %48 : f32 to vector<16x1xf32>
      %63 = arith.mulf %62, %58 : vector<16x1xf32>
      %64 = arith.addf %61, %63 : vector<16x1xf32>
      %c16_i32 = arith.constant 16 : i32
      %65 = arith.muli %arg0, %c16_i32 : i32
      %66 = tpu.iota {dimensions = array<i32: 0>} : vector<16x1xi32>
      %67 = vector.broadcast %65 : i32 to vector<16x1xi32>
      %68 = arith.addi %67, %66 : vector<16x1xi32>
      %c16_i32_40 = arith.constant 16 : i32
      %69 = vector.broadcast %c16_i32_40 : i32 to vector<16x1xi32>
      %70 = arith.cmpi slt, %68, %69 : vector<16x1xi32>
      %cst_41 = arith.constant 0.000000e+00 : f32
      %71 = vector.broadcast %cst_41 : f32 to vector<16x1xf32>
      %72 = arith.select %70, %64, %71 : vector<16x1xi1>, vector<16x1xf32>
      %73 = vector.shape_cast %72 : vector<16x1xf32> to vector<1x16x1xf32>
      %cst_42 = arith.constant dense<0.000000e+00> : vector<1xf32>
      %74 = vector.multi_reduction <add>, %73, %cst_42 [1, 2] : vector<1x16x1xf32> to vector<1xf32>
      %75 = vector.shape_cast %74 : vector<1xf32> to vector<1x1x1xf32>
      %76 = vector.extract %75[0, 0, 0] : f32 from vector<1x1x1xf32>
      %77 = vector.broadcast %76 : f32 to vector<1x8x128xf32>
      %c0_43 = arith.constant 0 : index
      %c0_44 = arith.constant 0 : index
      %c0_45 = arith.constant 0 : index
      %78 = vector.load %arg5[%c0_43, %c0_44, %c0_45] : memref<1x8x128xf32, #tpu.memory_space<vmem>>, vector<1x8x128xf32>
      tpu.vector_store %arg5[%c0_43, %c0_44, %c0_45], %77 {strides = array<i32>} : memref<1x8x128xf32, #tpu.memory_space<vmem>>, vector<1x8x128xf32>,
    } else {
    }
    return
  }
  func.func @transform_0(%arg0: i32, %arg1: i32) -> (i32, i32) {
    %c0_i32 = arith.constant 0 : i32
    return %arg0, %arg1 : i32, i32
  }
  func.func @transform_1(%arg0: i32, %arg1: i32) -> (i32, i32) {
    %c0_i32 = arith.constant 0 : i32
    %c0_i32_0 = arith.constant 0 : i32
    return %arg0, %c0_i32 : i32, i32
  }
  func.func @transform_2(%arg0: i32, %arg1: i32) -> i32 {
    %c0_i32 = arith.constant 0 : i32
    %c0_i32_0 = arith.constant 0 : i32
    return %c0_i32 : i32
  }
  func.func @transform_3(%arg0: i32, %arg1: i32) -> (i32, i32, i32) {
    %c0_i32 = arith.constant 0 : i32
    %c0_i32_0 = arith.constant 0 : i32
    %c0_i32_1 = arith.constant 0 : i32
    return %arg0, %c0_i32, %c0_i32_0 : i32, i32, i32
  }
}

</mosaic_0001>

<bundles_post_ra>
// kernel: tpu_custom_call.1
= control target key start
LH: loop header
LB: loop body
LE: loop exit
PB: predicated region body
PF: predicated region fallthrough
CT: control target
= control target key end

     0   :  { %vm32_vm0 = vcmask 7168   ;;  %v234_v1 = vmov -1e+30   ;;  %s306_s0 = inlined_call_operand.vmem [shape: f32[16,128], index: 0, kind: input, shape index: {}]   ;;  %s307_s1 = inlined_call_operand.vmem [shape: s32[16,1], index: 1, kind: input, shape index: {}]   ;;  %s308_s2 = inlined_call_operand.<no memory space> [shape: f32[1], index: 2, kind: input, shape index: {}]   ;;  %s309_s3 = inlined_call_operand.hbm [shape: f32[1,8,128], index: 3, kind: output, shape index: {}]  }
   0x1   :  { %v16_v0 = vld [vmem:[%s306_s0] sm:$0xff]  ;;  %33 = vst.msk [vmem:[#allocation2] sm:$0xff] %vm32_vm0, %v234_v1  ;;  %34 = vst.msk [vmem:[#allocation2 + $0x8] sm:$0xff] %vm32_vm0, %v234_v1 }
   0x2   :  { %43 = vmax.xlane.f32.xlu0 %v16_v0 }
   0x3   :  { %9 = vsyncpa [#allocation8], 0  ;;  %v17_v2 = vld [vmem:[%s306_s0 + $0x8] sm:$0xff]  ;;  %v235_v3 = vmov 0   ;;  %v236_v4 = vmov 0.0   ;;  %v96_v5 = vld [vmem:[%s307_s1] sm:$0xff]  ;;  %v19_v22 = vlaneseq  ;;  %v146_v1 = vstv %s308_s2 }
   0x4   :  { %196 = vset.pattern.permute.xlu1 %v235_v3  ;;  %197 = vset.pattern.permute.xlu0 %v235_v3  ;;  %35 = vst.msk [vmem:[#allocation3] sm:$0xff] %vm32_vm0, %v236_v4  ;;  %36 = vst.msk [vmem:[#allocation3 + $0x8] sm:$0xff] %vm32_vm0, %v236_v4  ;;  %v97_v14 = vld [vmem:[%s307_s1 + $0x8] sm:$0xff]  ;;  %s142_s20 = ssub.f32 1.0, %s308_s2  ;;  %s237_s2 = smov [#allocation7]  }
   0x5   :  { %37 = vst.msk [vmem:[#allocation4] sm:$0xff] %vm32_vm0, %v236_v4  ;;  %38 = vst.msk [vmem:[#allocation4 + $0x8] sm:$0xff] %vm32_vm0, %v236_v4  ;;  %v20_v25 = vand.u32 127, %v19_v22  ;;  %s182_s23 = sshll.u32 %s237_s2, 4  ;;  %s183_s23 = int_to_ptr.vmem [resolvable:$true] %s182_s23 }
   0x6   :  { %45 = vmax.xlane.f32.xlu0 %v17_v2  ;;  %39 = vst.msk [vmem:[#allocation5] sm:$0xff] %vm32_vm0, %v236_v4  ;;  %40 = vst.msk [vmem:[#allocation5 + $0x8] sm:$0xff] %vm32_vm0, %v236_v4  ;;  %s210_s25 = scalar_lea.vmem %s183_s23, 128  ;;  %p215_p1 = scmp.lt.s32.totalorder %s183_s23, %s183_s23 }
   0x7   :  { %p211_p0 = scmp.ne.s32.totalorder %s183_s23, %s210_s25  ;;  %p216_p2 = scmp.lt.s32.totalorder %s210_s25, %s210_s25 }
   0x8   :  { %v41_v6 = vld [vmem:[#allocation2] sm:$0xff]  ;;  %v42_v9 = vld [vmem:[#allocation2 + $0x8] sm:$0xff] }
   0x9   :  { %p217_p3 = por %p216_p2, %p215_p1 }
   0xb   :  { %v49_v35 = vld [vmem:[#allocation3] sm:$0xff]  ;;  %v50_v39 = vld [vmem:[#allocation3 + $0x8] sm:$0xff]  ;;  %p218_p4 = pnand %p217_p3, %p211_p0 }
   0xc   :  { %v86_v29 = vld [vmem:[#allocation4] sm:$0xff]  ;;  %v87_v44 = vld [vmem:[#allocation4 + $0x8] sm:$0xff] }
   0xd   :  { %v106_v47 = vld [vmem:[#allocation5] sm:$0xff]  ;;  %v107_v51 = vld [vmem:[#allocation5 + $0x8] sm:$0xff] }
  0x1c   :  { %99 = vperm.xlu0 %197, %v96_v5  }
  0x3b   :  { %88 = vadd.xlane.f32.xlu0 %v16_v0 }
  0x8f   :  { %v44_v7 = vpop.xlane.xlu0 %43 }
  0x90   :  { %v47_v8 = vmax.f32 %v41_v6, %v44_v7 }
  0x92   :  { %v51_v10 = vsub.f32 %v41_v6, %v47_v8  ;;  %84 = vst.msk [vmem:[#allocation2] sm:$0xff] %vm32_vm0, %v47_v8  ;;  %61 = vperm.xlu1 %196, %v47_v8  }
  0x93   :  { %v46_v11 = vpop.xlane.xlu0 %45 }
  0x94   :  { %v48_v12 = vmax.f32 %v42_v9, %v46_v11  ;;  %v53_v32 = vmul.f32 1.442695, %v51_v10 }
  0x96   :  { %v52_v13 = vsub.f32 %v42_v9, %v48_v12  ;;  %85 = vst.msk [vmem:[#allocation2 + $0x8] sm:$0xff] %vm32_vm0, %v48_v12  ;;  %66 = vperm.xlu1 %196, %v48_v12  }
  0x98   :  { %v55_v33 = vmul.f32 1.442695, %v52_v13 }
  0x99   :  { %v122_v59 = vld [vmem:[#allocation2] sm:$0xff] }
  0x9a   :  { %102 = vperm.xlu1 %196, %v97_v14  }
  0x9b   :  { %v100_v24 = vpop.permute.xlu0 %99 }
  0x9c   :  { %vm104_vm1 = vcmp.eq.s32.totalorder %v20_v25, %v100_v24 }
  0x9d   :  { %v108_v27 = vsel %vm104_vm1, %v16_v0, 0.0  ;;  %v123_v5 = vld [vmem:[#allocation2 + $0x8] sm:$0xff] }
  0xc8   :  { %v89_v30 = vpop.xlane.xlu0 %88 }
  0xc9   :  { %v92_v31 = vadd.f32 %v89_v30, %v86_v29 }
  0xcb   :  { %94 = vst.msk [vmem:[#allocation4] sm:$0xff] %vm32_vm0, %v92_v31 }
  0xd2   :  { %v136_v55 = vld [vmem:[#allocation4] sm:$0xff] }
  0xd3   :  { %v138_v58 = vmul.f32 0.0078125, %v136_v55 }
 0x111   :  { %v62_v15 = vpop.permute.xlu1 %61 }
 0x112   :  { %v69_v16 = vsub.f32 %v16_v0, %v62_v15  ;;  %v143_v0 = vstv %s142_s20 }
 0x114   :  { %v71_v17 = vmul.f32 1.442695, %v69_v16 }
 0x115   :  { %v67_v18 = vpop.permute.xlu1 %66 }
 0x116   :  { %198 = vpow2.f32 %v71_v17  ;;  %v70_v19 = vsub.f32 %v17_v2, %v67_v18 }
 0x118   :  { %v73_v20 = vmul.f32 1.442695, %v70_v19 }
 0x119   :  { %v103_v26 = vpop.permute.xlu1 %102 }
 0x11a   :  { %200 = vpow2.f32 %v73_v20  ;;  %vm105_vm2 = vcmp.eq.s32.totalorder %v20_v25, %v103_v26 }
 0x11b   :  { %v109_v28 = vsel %vm105_vm2, %v17_v2, 0.0  ;;  %202 = vpow2.f32 %v53_v32 }
 0x11c   :  { %204 = vpow2.f32 %v55_v33 }
 0x120   :  { %v199_v21 = vpop.eup %198 }
 0x121   :  { %75 = vadd.xlane.f32.xlu1 %v199_v21 }
 0x124   :  { %v201_v23 = vpop.eup %200 }
 0x125   :  { %77 = vadd.xlane.f32.xlu1 %v201_v23  ;;  %v203_v34 = vpop.eup %202 }
 0x126   :  { %v57_v36 = vmul.f32 %v203_v34, %v49_v35  ;;  %v205_v37 = vpop.eup %204 }
 0x127   :  { %v58_v41 = vmul.f32 %v205_v37, %v50_v39 }
 0x129   :  { %90 = vadd.xlane.f32.xlu1 %v17_v2 }
 0x12d   :  { %110 = vadd.xlane.f32.xlu1 %v108_v27 }
 0x131   :  { %112 = vadd.xlane.f32.xlu1 %v109_v28 }
 0x1ae   :  { %v76_v38 = vpop.xlane.xlu1 %75 }
 0x1af   :  { %v79_v40 = vadd.f32 %v76_v38, %v57_v36 }
 0x1b1   :  { %82 = vst.msk [vmem:[#allocation3] sm:$0xff] %vm32_vm0, %v79_v40 }
 0x1b2   :  { %v78_v42 = vpop.xlane.xlu1 %77 }
 0x1b3   :  { %v80_v43 = vadd.f32 %v78_v42, %v58_v41 }
 0x1b5   :  { %83 = vst.msk [vmem:[#allocation3 + $0x8] sm:$0xff] %vm32_vm0, %v80_v43 }
 0x1b6   :  { %v91_v45 = vpop.xlane.xlu1 %90 }
 0x1b7   :  { %v93_v46 = vadd.f32 %v91_v45, %v87_v44 }
 0x1b8   :  { %v124_v48 = vld [vmem:[#allocation3] sm:$0xff] }
 0x1b9   :  { %95 = vst.msk [vmem:[#allocation4 + $0x8] sm:$0xff] %vm32_vm0, %v93_v46  ;;  %206 = vlog2.f32 %v124_v48 }
 0x1ba   :  { %v111_v49 = vpop.xlane.xlu1 %110 }
 0x1bb   :  { %v114_v50 = vadd.f32 %v111_v49, %v106_v47 }
 0x1bc   :  { %v125_v52 = vld [vmem:[#allocation3 + $0x8] sm:$0xff] }
 0x1bd   :  { %116 = vst.msk [vmem:[#allocation5] sm:$0xff] %vm32_vm0, %v114_v50  ;;  %208 = vlog2.f32 %v125_v52 }
 0x1be   :  { %v113_v53 = vpop.xlane.xlu1 %112 }
 0x1bf   :  { %v115_v54 = vadd.f32 %v113_v53, %v107_v51 }
 0x1c0   :  { %v137_v63 = vld [vmem:[#allocation4 + $0x8] sm:$0xff] }
 0x1c1   :  { %117 = vst.msk [vmem:[#allocation5 + $0x8] sm:$0xff] %vm32_vm0, %v115_v54  ;;  %v139_v7 = vmul.f32 0.0078125, %v137_v63 }
 0x1c3   :  { %v207_v56 = vpop.eup %206 }
 0x1c4   :  { %v127_v57 = vmul.f32 0.6931472, %v207_v56  ;;  %v132_v60 = vld [vmem:[#allocation5] sm:$0xff] }
 0x1c6   :  { %v130_v61 = vadd.f32 %v127_v57, %v122_v59 }
 0x1c7   :  { %v209_v62 = vpop.eup %208 }
 0x1c8   :  { %v129_v2 = vmul.f32 0.6931472, %v209_v62  ;;  %v134_v3 = vsub.f32 %v132_v60, %v130_v61  ;;  %v140_v4 = vsub.f32 %v138_v58, %v130_v61  ;;  %v133_v10 = vld [vmem:[#allocation5 + $0x8] sm:$0xff] }
 0x1ca   :  { %v131_v6 = vadd.f32 %v129_v2, %v123_v5  ;;  %v144_v8 = vmul.f32 %v143_v0, %v134_v3  ;;  %v147_v9 = vmul.f32 %v146_v1, %v140_v4 }
 0x1cc   :  { %v135_v11 = vsub.f32 %v133_v10, %v131_v6  ;;  %v141_v12 = vsub.f32 %v139_v7, %v131_v6  ;;  %v149_v15 = vadd.f32 %v147_v9, %v144_v8 }
 0x1ce   :  { %v145_v13 = vmul.f32 %v143_v0, %v135_v11  ;;  %v148_v14 = vmul.f32 %v146_v1, %v141_v12  ;;  %v162_v17 = vsel %vm32_vm0, %v149_v15, 0.0 }
 0x1d0   :  { %v150_v16 = vadd.f32 %v148_v14, %v145_v13 }
 0x1d2   :  { %v163_v18 = vsel %vm32_vm0, %v150_v16, 0.0 }
 0x1d3   :  { %v164_v19 = vadd.f32 %v163_v18, %v162_v17 }
 0x1d5   :  { %165 = vadd.xlane.f32.xlu1 %v164_v19 }
 0x262   :  { %v166_v20 = vpop.xlane.xlu1 %165 }
 0x263   :  { %v167_v21 = vrot.slane %v166_v20, 4 }
 0x265   :  { %v168_v22 = vadd.f32 %v167_v21, %v166_v20 }
 0x267   :  { %v169_v23 = vrot.slane %v168_v22, 2 }
 0x269   :  { %v170_v24 = vadd.f32 %v169_v23, %v168_v22 }
 0x26b   :  { %v171_v25 = vrot.slane %v170_v24, 1 }
 0x26d   :  { %v172_v26 = vadd.f32 %v171_v25, %v170_v24 }
 0x26f   :  { %190 = vpush %v172_v26 }
 0x2a0   :  { %s191_s24 = spop %190 }
 0x2a1   :  { %v174_v27 = vstv %s191_s24 }
 0x2a2   :  { %175 = vst [vmem:[#allocation7] sm:$0xff] %v174_v27 }
 0x2a3   :  { %221 = shalt.err (!%p218_p4)
}
 0x2a4   :  { %s222_s28 = scalar_lea.hbm %s309_s3, 128 }
 0x2a5   :  { %p223_p5 = scmp.ne.s32.totalorder %s309_s3, %s222_s28  ;;  %p226_p6 = scmp.lt.u32.totalorder %s222_s28, %s309_s3 }
 0x2a7   :  { %p228_p7 = pnand %p226_p6, %p223_p5 }
 0x2a9   :  { %231 = shalt.err (!%p228_p7)
}
 0x2aa   :  { %185 = dma.vmem_to_hbm [thread:$0]  %s183_s23, 128, %s309_s3, [#allocation8]  }
 0x2ab   :  { %232 = dma.done.wait [#allocation8], 128  }
 0x2ac   :  { %233 = vsyncadd [#allocation8], 4294967168 }
 0x2ad   :  { %189 = vsyncpa [#allocation8], 1 }

</bundles_post_ra>
